<compile_context>
chip_gen: v5e
topology: v5e:2x2
jax: 0.10.0
libtpu: 0.0.40
codegen_flags: <defaults>
</compile_context>

<pallas_src>
import math

import jax
import jax.numpy as jnp
from jax.experimental import pallas as pl
from jax.experimental.pallas import tpu as pltpu


# ----------------------------------------------------------------------------
# In-kernel helpers
# ----------------------------------------------------------------------------
_INV_SQRT2 = 0.7071067811865476


def _gelu(x):
    # Exact erf-based GELU (torch.nn.GELU default); erf runs on the EUP.
    return 0.5 * x * (1.0 + jax.lax.erf(x * _INV_SQRT2))


# ----------------------------------------------------------------------------
# Fused kernel: linear -> GELU -> linear -> +bias -> +residual -> LayerNorm
# ----------------------------------------------------------------------------
def _projection_head_kernel(x_ref, w1_ref, b1_ref, w2_ref, b2_ref,
                            g_ref, beta_ref, o_ref):
    # projected = x @ W1 + b1        (bf16 MXU inputs, f32 accumulation)
    proj = jnp.dot(x_ref[...], w1_ref[...],
                   preferred_element_type=jnp.float32) + b1_ref[...]

    # y = GELU(projected) @ W2 + b2 + projected
    h = _gelu(proj).astype(w2_ref.dtype)
    y = jnp.dot(h, w2_ref[...], preferred_element_type=jnp.float32)
    y = y + b2_ref[...] + proj

    # LayerNorm over the full feature dim (block spans all of P).
    inv_n = 1.0 / y.shape[-1]
    mean = jnp.sum(y, axis=-1, keepdims=True) * inv_n
    yc = y - mean
    var = jnp.sum(yc * yc, axis=-1, keepdims=True) * inv_n
    inv_std = jax.lax.rsqrt(var + 1e-5)
    o_ref[...] = ((yc * inv_std) * g_ref[...] + beta_ref[...]).astype(o_ref.dtype)


# ----------------------------------------------------------------------------
# Wrapper
# ----------------------------------------------------------------------------
def _round_up(x, m):
    return ((x + m - 1) // m) * m


def prepare_params(params):
    """One-time prep: bf16 weights for the MXU, lane-shaped (1, P) f32 vectors."""
    P = params["w1"].shape[1]
    return {
        "w1": params["w1"].astype(jnp.bfloat16),
        "w2": params["w2"].astype(jnp.bfloat16),
        "b1": params["b1"].reshape(1, P).astype(jnp.float32),
        "b2": params["b2"].reshape(1, P).astype(jnp.float32),
        "gamma": params["gamma"].reshape(1, P).astype(jnp.float32),
        "beta": params["beta"].reshape(1, P).astype(jnp.float32),
    }


def projection_head_forward(x, prepared):
    """ProjectionHead.forward.  x: [..., embedding_dim] -> [..., projection_dim].

    `prepared` must come from prepare_params (bf16 weights held across calls).
    """
    E, P = prepared["w1"].shape
    assert E % 128 == 0 and P % 128 == 0, "embedding/projection dims must be 128-aligned"
    orig_lead = x.shape[:-1]
    assert x.shape[-1] == E
    M = int(math.prod(orig_lead)) if orig_lead else 1

    # Single cast to bf16 (MXU-native); no intermediate f32 materialization.
    x2 = x.reshape(M, E).astype(jnp.bfloat16)

    # Row tiling: fill the 256-wide MXU (v6e/v7x) when there are enough rows,
    # fall back to 128, otherwise a single sublane-padded tile.
    M_pad = max(8, _round_up(M, 8))
    if M_pad >= 256:
        tm = 256
        M_pad = _round_up(M_pad, tm)
    elif M_pad >= 128:
        tm = 128
        M_pad = _round_up(M_pad, tm)
    else:
        tm = M_pad
    if M_pad != M:
        x2 = jnp.pad(x2, ((0, M_pad - M), (0, 0)))

    # VMEM budget: double-buffered inputs/outputs + resident bf16 weights, with
    # headroom, capped under v7x's 64 MiB physical VMEM.
    resident = 2 * (E * P * 2 + P * P * 2 + tm * E * 2 + 4 * P * 4) + 2 * (tm * P * 4)
    vmem_limit = int(min(max(resident + (8 << 20), 16 << 20), 48 << 20))

    out = pl.pallas_call(
        _projection_head_kernel,
        grid=(M_pad // tm,),
        in_specs=[
            pl.BlockSpec((tm, E), lambda i: (i, 0)),   # x row block (bf16)
            pl.BlockSpec((E, P), lambda i: (0, 0)),    # W1 resident (bf16)
            pl.BlockSpec((1, P), lambda i: (0, 0)),    # b1
            pl.BlockSpec((P, P), lambda i: (0, 0)),    # W2 resident (bf16)
            pl.BlockSpec((1, P), lambda i: (0, 0)),    # b2
            pl.BlockSpec((1, P), lambda i: (0, 0)),    # gamma
            pl.BlockSpec((1, P), lambda i: (0, 0)),    # beta
        ],
        out_specs=pl.BlockSpec((tm, P), lambda i: (i, 0)),
        out_shape=jax.ShapeDtypeStruct((M_pad, P), jnp.float32),
        compiler_params=pltpu.CompilerParams(
            dimension_semantics=("parallel",),   # shards over v7x's 2 TensorCores
            vmem_limit_bytes=vmem_limit,
        ),
    )(
        x2,
        prepared["w1"],
        prepared["b1"],
        prepared["w2"],
        prepared["b2"],
        prepared["gamma"],
        prepared["beta"],
    )

    return out[:M].reshape(orig_lead + (P,))


# ----------------------------------------------------------------------------
# Parameters (deterministic, PyTorch-like init) + pure-JAX reference
# ----------------------------------------------------------------------------
def build_projection_head_params(embedding_dim, projection_dim, key):
    k1, k2, k3, k4 = jax.random.split(key, 4)
    s1 = 1.0 / (embedding_dim ** 0.5)
    s2 = 1.0 / (projection_dim ** 0.5)
    return {
        "w1": jax.random.uniform(k1, (embedding_dim, projection_dim), jnp.float32, -s1, s1),
        "b1": jax.random.uniform(k2, (projection_dim,), jnp.float32, -s1, s1),
        "w2": jax.random.uniform(k3, (projection_dim, projection_dim), jnp.float32, -s2, s2),
        "b2": jax.random.uniform(k4, (projection_dim,), jnp.float32, -s2, s2),
        "gamma": jnp.ones((projection_dim,), jnp.float32),
        "beta": jnp.zeros((projection_dim,), jnp.float32),
    }


def projection_head_reference(x, params):
    proj = x @ params["w1"] + params["b1"]
    y = _gelu(proj) @ params["w2"] + params["b2"]
    y = y + proj
    mean = jnp.mean(y, axis=-1, keepdims=True)
    var = jnp.mean((y - mean) ** 2, axis=-1, keepdims=True)
    return (y - mean) / jnp.sqrt(var + 1e-5) * params["gamma"] + params["beta"]


# ----------------------------------------------------------------------------
if __name__ == "__main__":
    key = jax.random.PRNGKey(0)
    BATCH, EMBED_DIM, PROJ_DIM = 2, 512, 256

    params = build_projection_head_params(EMBED_DIM, PROJ_DIM, jax.random.fold_in(key, 1))
    prepared = prepare_params(params)
    x = jax.random.normal(jax.random.fold_in(key, 2), (BATCH, EMBED_DIM), jnp.float32)

    out = projection_head_forward(x, prepared)
    out = jax.block_until_ready(out)

    assert out.shape == (BATCH, PROJ_DIM), out.shape
    assert bool(jnp.all(jnp.isfinite(out)))

    ref = projection_head_reference(x, params)
    max_err = float(jnp.max(jnp.abs(out - ref)))
    assert max_err < 5e-2, f"max abs err {max_err} too large"  # bf16-matmul tolerance

    print("KERNEL_OK")
</pallas_src>

<mosaic_0001>
module attributes {stable_mosaic.version = 11 : i64} {
  func.func @_projection_head_kernel(%arg0: i32, %arg1: memref<8x512xbf16, #tpu.memory_space<vmem>>, %arg2: memref<512x256xbf16, #tpu.memory_space<vmem>>, %arg3: memref<1x256xf32, #tpu.memory_space<vmem>>, %arg4: memref<256x256xbf16, #tpu.memory_space<vmem>>, %arg5: memref<1x256xf32, #tpu.memory_space<vmem>>, %arg6: memref<1x256xf32, #tpu.memory_space<vmem>>, %arg7: memref<1x256xf32, #tpu.memory_space<vmem>>, %arg8: memref<8x256xf32, #tpu.memory_space<vmem>>) attributes {dimension_semantics = [#tpu.dimension_semantics<parallel>], iteration_bounds = array<i64: 1>, scalar_prefetch = 0 : i64, scratch_operands = 0 : i64, tpu.core_type = #tpu.core_type<tc>, window_params = [{transform_indices = @transform_0, window_bounds = array<i64: 8, 512>}, {pipeline_mode = #tpu.pipeline_mode<synchronous>, transform_indices = @transform_1, window_bounds = array<i64: 512, 256>}, {pipeline_mode = #tpu.pipeline_mode<synchronous>, transform_indices = @transform_2, window_bounds = array<i64: 1, 256>}, {pipeline_mode = #tpu.pipeline_mode<synchronous>, transform_indices = @transform_3, window_bounds = array<i64: 256, 256>}, {pipeline_mode = #tpu.pipeline_mode<synchronous>, transform_indices = @transform_4, window_bounds = array<i64: 1, 256>}, {pipeline_mode = #tpu.pipeline_mode<synchronous>, transform_indices = @transform_5, window_bounds = array<i64: 1, 256>}, {pipeline_mode = #tpu.pipeline_mode<synchronous>, transform_indices = @transform_6, window_bounds = array<i64: 1, 256>}, {transform_indices = @transform_7, window_bounds = array<i64: 8, 256>}]} {
    %c0 = arith.constant 0 : index
    %c0_0 = arith.constant 0 : index
    %0 = vector.load %arg1[%c0, %c0_0] : memref<8x512xbf16, #tpu.memory_space<vmem>>, vector<8x512xbf16>
    %c0_1 = arith.constant 0 : index
    %c0_2 = arith.constant 0 : index
    %1 = vector.load %arg2[%c0_1, %c0_2] : memref<512x256xbf16, #tpu.memory_space<vmem>>, vector<512x256xbf16>
    %cst = arith.constant dense<0.000000e+00> : vector<8x256xf32>
    %2 = tpu.matmul %0, %1, %cst {dimension_numbers = #tpu.dot_dimension_numbers<[1], [0], [0], [1], [0, 0, 1, 1], [], []>} : vector<8x512xbf16>, vector<512x256xbf16>, vector<8x256xf32> -> vector<8x256xf32>
    %c0_3 = arith.constant 0 : index
    %c0_4 = arith.constant 0 : index
    %3 = vector.load %arg3[%c0_3, %c0_4] : memref<1x256xf32, #tpu.memory_space<vmem>>, vector<1x256xf32>
    %4 = vector.broadcast %3 : vector<1x256xf32> to vector<8x256xf32>
    %5 = arith.addf %2, %4 : vector<8x256xf32>
    %cst_5 = arith.constant 5.000000e-01 : f32
    %6 = vector.broadcast %cst_5 : f32 to vector<8x256xf32>
    %7 = arith.mulf %6, %5 : vector<8x256xf32>
    %cst_6 = arith.constant 0.707106769 : f32
    %8 = vector.broadcast %cst_6 : f32 to vector<8x256xf32>
    %9 = arith.mulf %5, %8 : vector<8x256xf32>
    %10 = math.erf %9 : vector<8x256xf32>
    %cst_7 = arith.constant 1.000000e+00 : f32
    %11 = vector.broadcast %cst_7 : f32 to vector<8x256xf32>
    %12 = arith.addf %11, %10 : vector<8x256xf32>
    %13 = arith.mulf %7, %12 : vector<8x256xf32>
    %14 = arith.truncf %13 : vector<8x256xf32> to vector<8x256xbf16>
    %c0_8 = arith.constant 0 : index
    %c0_9 = arith.constant 0 : index
    %15 = vector.load %arg4[%c0_8, %c0_9] : memref<256x256xbf16, #tpu.memory_space<vmem>>, vector<256x256xbf16>
    %cst_10 = arith.constant dense<0.000000e+00> : vector<8x256xf32>
    %16 = tpu.matmul %14, %15, %cst_10 {dimension_numbers = #tpu.dot_dimension_numbers<[1], [0], [0], [1], [0, 0, 1, 1], [], []>} : vector<8x256xbf16>, vector<256x256xbf16>, vector<8x256xf32> -> vector<8x256xf32>
    %c0_11 = arith.constant 0 : index
    %c0_12 = arith.constant 0 : index
    %17 = vector.load %arg5[%c0_11, %c0_12] : memref<1x256xf32, #tpu.memory_space<vmem>>, vector<1x256xf32>
    %18 = vector.broadcast %17 : vector<1x256xf32> to vector<8x256xf32>
    %19 = arith.addf %16, %18 : vector<8x256xf32>
    %20 = arith.addf %19, %5 : vector<8x256xf32>
    %cst_13 = arith.constant dense<0.000000e+00> : vector<8xf32>
    %21 = vector.multi_reduction <add>, %20, %cst_13 [1] : vector<8x256xf32> to vector<8xf32>
    %22 = vector.shape_cast %21 : vector<8xf32> to vector<8x1xf32>
    %cst_14 = arith.constant 3.906250e-03 : f32
    %23 = vector.broadcast %cst_14 : f32 to vector<8x1xf32>
    %24 = arith.mulf %22, %23 : vector<8x1xf32>
    %25 = vector.broadcast %24 : vector<8x1xf32> to vector<8x256xf32>
    %26 = arith.subf %20, %25 : vector<8x256xf32>
    %27 = arith.mulf %26, %26 : vector<8x256xf32>
    %cst_15 = arith.constant dense<0.000000e+00> : vector<8xf32>
    %28 = vector.multi_reduction <add>, %27, %cst_15 [1] : vector<8x256xf32> to vector<8xf32>
    %29 = vector.shape_cast %28 : vector<8xf32> to vector<8x1xf32>
    %cst_16 = arith.constant 3.906250e-03 : f32
    %30 = vector.broadcast %cst_16 : f32 to vector<8x1xf32>
    %31 = arith.mulf %29, %30 : vector<8x1xf32>
    %cst_17 = arith.constant 9.99999974E-6 : f32
    %32 = vector.broadcast %cst_17 : f32 to vector<8x1xf32>
    %33 = arith.addf %31, %32 : vector<8x1xf32>
    %34 = math.rsqrt %33 : vector<8x1xf32>
    %35 = vector.broadcast %34 : vector<8x1xf32> to vector<8x256xf32>
    %36 = arith.mulf %26, %35 : vector<8x256xf32>
    %c0_18 = arith.constant 0 : index
    %c0_19 = arith.constant 0 : index
    %37 = vector.load %arg6[%c0_18, %c0_19] : memref<1x256xf32, #tpu.memory_space<vmem>>, vector<1x256xf32>
    %38 = vector.broadcast %37 : vector<1x256xf32> to vector<8x256xf32>
    %39 = arith.mulf %36, %38 : vector<8x256xf32>
    %c0_20 = arith.constant 0 : index
    %c0_21 = arith.constant 0 : index
    %40 = vector.load %arg7[%c0_20, %c0_21] : memref<1x256xf32, #tpu.memory_space<vmem>>, vector<1x256xf32>
    %41 = vector.broadcast %40 : vector<1x256xf32> to vector<8x256xf32>
    %42 = arith.addf %39, %41 : vector<8x256xf32>
    %c0_22 = arith.constant 0 : index
    %c0_23 = arith.constant 0 : index
    %43 = vector.load %arg8[%c0_22, %c0_23] : memref<8x256xf32, #tpu.memory_space<vmem>>, vector<8x256xf32>
    tpu.vector_store %arg8[%c0_22, %c0_23], %42 {strides = array<i32>} : memref<8x256xf32, #tpu.memory_space<vmem>>, vector<8x256xf32>,
    return
  }
  func.func @transform_0(%arg0: i32) -> (i32, i32) {
    %c0_i32 = arith.constant 0 : i32
    %c0_i32_0 = arith.constant 0 : i32
    return %arg0, %c0_i32 : i32, i32
  }
  func.func @transform_1(%arg0: i32) -> (i32, i32) {
    %c0_i32 = arith.constant 0 : i32
    %c0_i32_0 = arith.constant 0 : i32
    %c0_i32_1 = arith.constant 0 : i32
    return %c0_i32, %c0_i32_0 : i32, i32
  }
  func.func @transform_2(%arg0: i32) -> (i32, i32) {
    %c0_i32 = arith.constant 0 : i32
    %c0_i32_0 = arith.constant 0 : i32
    %c0_i32_1 = arith.constant 0 : i32
    return %c0_i32, %c0_i32_0 : i32, i32
  }
  func.func @transform_3(%arg0: i32) -> (i32, i32) {
    %c0_i32 = arith.constant 0 : i32
    %c0_i32_0 = arith.constant 0 : i32
    %c0_i32_1 = arith.constant 0 : i32
    return %c0_i32, %c0_i32_0 : i32, i32
  }
  func.func @transform_4(%arg0: i32) -> (i32, i32) {
    %c0_i32 = arith.constant 0 : i32
    %c0_i32_0 = arith.constant 0 : i32
    %c0_i32_1 = arith.constant 0 : i32
    return %c0_i32, %c0_i32_0 : i32, i32
  }
  func.func @transform_5(%arg0: i32) -> (i32, i32) {
    %c0_i32 = arith.constant 0 : i32
    %c0_i32_0 = arith.constant 0 : i32
    %c0_i32_1 = arith.constant 0 : i32
    return %c0_i32, %c0_i32_0 : i32, i32
  }
  func.func @transform_6(%arg0: i32) -> (i32, i32) {
    %c0_i32 = arith.constant 0 : i32
    %c0_i32_0 = arith.constant 0 : i32
    %c0_i32_1 = arith.constant 0 : i32
    return %c0_i32, %c0_i32_0 : i32, i32
  }
  func.func @transform_7(%arg0: i32) -> (i32, i32) {
    %c0_i32 = arith.constant 0 : i32
    %c0_i32_0 = arith.constant 0 : i32
    return %arg0, %c0_i32 : i32, i32
  }
}

</mosaic_0001>

<bundles_post_ra>
// kernel: tpu_custom_call.1
= control target key start
LH: loop header
LB: loop body
LE: loop exit
PB: predicated region body
PF: predicated region fallthrough
CT: control target
= control target key end

     0   :  { %12 = vsyncpa [#allocation3], 0  ;;  %s1803_s0 = inlined_call_operand.hbm [shape: bf16[8,512], index: 0, kind: input, shape index: {}]   ;;  %s1804_s1 = inlined_call_operand.hbm [shape: bf16[512,256], index: 1, kind: input, shape index: {}]   ;;  %s1805_s2 = inlined_call_operand.hbm [shape: f32[1,256], index: 2, kind: input, shape index: {}]   ;;  %s1806_s3 = inlined_call_operand.hbm [shape: bf16[256,256], index: 3, kind: input, shape index: {}]   ;;  %s1807_s4 = inlined_call_operand.vmem [shape: f32[1,256], index: 4, kind: input, shape index: {}]   ;;  %s1808_s5 = inlined_call_operand.vmem [shape: f32[1,256], index: 5, kind: input, shape index: {}]   ;;  %s1809_s6 = inlined_call_operand.hbm [shape: f32[1,256], index: 6, kind: input, shape index: {}]   ;;  %s1810_s7 = inlined_call_operand.hbm [shape: f32[8,256], index: 7, kind: output, shape index: {}]  }
   0x1   :  { %13 = vsyncpa [#allocation6], 0 }
   0x2   :  { %14 = vsyncpa [#allocation9], 0  ;;  %s31_s26 = sshll.u32 %s1804_s1, 4  ;;  %s32_s26 = int_to_ptr.hbm [resolvable:$true] %s31_s26 }
   0x3   :  { %15 = vsyncpa [#allocation4], 0  ;;  %s1661_s27 = smov [#allocation5]   ;;  %s55_s8 = sshll.u32 %s1806_s3, 4  ;;  %s56_s8 = int_to_ptr.hbm [resolvable:$true] %s55_s8 }
   0x4   :  { %s33_s28 = sshll.u32 %s1661_s27, 4  ;;  %s1662_s9 = smov 128   ;;  %s34_s28 = int_to_ptr.vmem [resolvable:$true] %s33_s28 }
   0x5   :  { %s1663_s10 = smov 8   ;;  %s1664_s11 = smov [#allocation8]  }
   0x6   :  { %39 = dma.hbm_to_vmem [thread:$0]  %s32_s26, 8192, %s34_s28, [#allocation6], %s1662_s9, %s1662_s9, %s1663_s10  }
   0x7   :  { %s57_s12 = sshll.u32 %s1664_s11, 4  ;;  %s21_s15 = sshll.u32 %s1803_s0, 4  ;;  %s58_s12 = int_to_ptr.vmem [resolvable:$true] %s57_s12  ;;  %s22_s15 = int_to_ptr.hbm [resolvable:$true] %s21_s15 }
   0x8   :  { %63 = dma.hbm_to_vmem [thread:$0]  %s56_s8, 4096, %s58_s12, [#allocation9], %s1662_s9, %s1662_s9, %s1663_s10  }
   0x9   :  { %s45_s17 = sshll.u32 %s1805_s2, 4  ;;  %s1665_s18 = smov [#allocation2]   ;;  %s46_s17 = int_to_ptr.hbm [resolvable:$true] %s45_s17 }
   0xa   :  { %s23_s19 = sshll.u32 %s1665_s18, 4  ;;  %s1666_s3 = smov [#allocation7]   ;;  %s24_s19 = int_to_ptr.vmem [resolvable:$true] %s23_s19 }
   0xb   :  { %26 = dma.hbm_to_vmem [thread:$0]  %s22_s15, 256, %s24_s19, [#allocation3]  }
   0xc   :  { %s47_s20 = sshll.u32 %s1666_s3, 4  ;;  %s73_s23 = sshll.u32 %s1809_s6, 4  ;;  %s48_s20 = int_to_ptr.vmem [resolvable:$true] %s47_s20  ;;  %s74_s23 = int_to_ptr.hbm [resolvable:$true] %s73_s23 }
   0xd   :  { %50 = dma.hbm_to_vmem [thread:$0]  %s46_s17, 32, %s48_s20, [#allocation6]  }
   0xe   :  { %s1667_s0 = smov [#allocation10]  }
   0xf   :  { %s75_s24 = sshll.u32 %s1667_s0, 4  ;;  %s76_s24 = int_to_ptr.vmem [resolvable:$true] %s75_s24 }
  0x10   :  { %78 = dma.hbm_to_vmem [thread:$0]  %s74_s23, 32, %s76_s24, [#allocation9]  }
  0x11   :  { %1653 = dma.done.wait [#allocation3], 256  }
  0x12   :  { %1654 = vsyncadd [#allocation3], 4294967040 }
  0x13   :  { %1655 = dma.done.wait [#allocation6], 8224  }
  0x14   :  { %1656 = vsyncadd [#allocation6], 4294959072 }
  0x15   :  { %1657 = dma.done.wait [#allocation9], 4128  }
  0x16   :  { %1658 = vsyncadd [#allocation9], 4294963168  ;;  %v1071_v0 = vld [vmem:[#allocation5 + $0x70] sm:$0xf]  ;;  %v1414_v1 = vld [vmem:[#allocation5 + $0x74] sm:$0xf0] }
  0x17   :  { %v1135_v2 = vld [vmem:[#allocation5 + $0xf0] sm:$0xf]  ;;  %v1072_v3 = vor.u32 %v1414_v1, %v1071_v0  ;;  %v1430_v4 = vld [vmem:[#allocation5 + $0xf4] sm:$0xf0]  ;;  %v1063_v11 = vld [vmem:[#allocation5 + $0x60] sm:$0xf] }
  0x18   :  { %v1199_v5 = vld [vmem:[#allocation5 + $0x170] sm:$0xf]  ;;  %v1446_v6 = vld [vmem:[#allocation5 + $0x174] sm:$0xf0]  ;;  %v1136_v7 = vor.u32 %v1430_v4, %v1135_v2  ;;  %v1412_v13 = vld [vmem:[#allocation5 + $0x64] sm:$0xf0] }
  0x19   :  { %v1200_v8 = vor.u32 %v1446_v6, %v1199_v5  ;;  %v1263_v9 = vld [vmem:[#allocation5 + $0x1f0] sm:$0xf]  ;;  %v1462_v10 = vld [vmem:[#allocation5 + $0x1f4] sm:$0xf0]  ;;  %505 = vmatpush.bf16.msra.mxu0 %v1072_v3  ;;  %v1127_v14 = vld [vmem:[#allocation5 + $0xe0] sm:$0xf]  ;;  %v1064_v16 = vor.u32 %v1412_v13, %v1063_v11 }
  0x1a   :  { %v1264_v12 = vor.u32 %v1462_v10, %v1263_v9  ;;  %v1428_v15 = vld [vmem:[#allocation5 + $0xe4] sm:$0xf0]  ;;  %518 = vmatpush.bf16.msra.mxu1 %v1136_v7  ;;  %v1191_v18 = vld [vmem:[#allocation5 + $0x160] sm:$0xf]  ;;  %v1055_v23 = vld [vmem:[#allocation5 + $0x50] sm:$0xf] }
  0x1b   :  { %531 = vmatpush.bf16.msra.mxu2 %v1200_v8  ;;  %v1128_v17 = vor.u32 %v1428_v15, %v1127_v14  ;;  %v1444_v19 = vld [vmem:[#allocation5 + $0x164] sm:$0xf0]  ;;  %v1255_v20 = vld [vmem:[#allocation5 + $0x1e0] sm:$0xf]  ;;  %v1410_v24 = vld [vmem:[#allocation5 + $0x54] sm:$0xf0] }
  0x1c   :  { %544 = vmatpush.bf16.msra.mxu3 %v1264_v12  ;;  %v1192_v21 = vor.u32 %v1444_v19, %v1191_v18  ;;  %v1460_v22 = vld [vmem:[#allocation5 + $0x1e4] sm:$0xf0]  ;;  %v1119_v26 = vld [vmem:[#allocation5 + $0xd0] sm:$0xf]  ;;  %v1426_v27 = vld [vmem:[#allocation5 + $0xd4] sm:$0xf0]  ;;  %v1056_v29 = vor.u32 %v1410_v24, %v1055_v23 }
  0x1d   :  { %v1256_v25 = vor.u32 %v1460_v22, %v1255_v20  ;;  %v1183_v28 = vld [vmem:[#allocation5 + $0x150] sm:$0xf]  ;;  %506 = vmatpush.bf16.msra.mxu0 %v1064_v16  ;;  %v1442_v30 = vld [vmem:[#allocation5 + $0x154] sm:$0xf0]  ;;  %v1120_v33 = vor.u32 %v1426_v27, %v1119_v26  ;;  %v1047_v35 = vld [vmem:[#allocation5 + $0x40] sm:$0xf] }
  0x1e   :  { %v1247_v31 = vld [vmem:[#allocation5 + $0x1d0] sm:$0xf]  ;;  %v1458_v32 = vld [vmem:[#allocation5 + $0x1d4] sm:$0xf0]  ;;  %519 = vmatpush.bf16.msra.mxu1 %v1128_v17  ;;  %v1184_v34 = vor.u32 %v1442_v30, %v1183_v28  ;;  %v1408_v36 = vld [vmem:[#allocation5 + $0x44] sm:$0xf0] }
  0x1f   :  { %532 = vmatpush.bf16.msra.mxu2 %v1192_v21  ;;  %v1111_v37 = vld [vmem:[#allocation5 + $0xc0] sm:$0xf]  ;;  %v1248_v38 = vor.u32 %v1458_v32, %v1247_v31  ;;  %v1424_v39 = vld [vmem:[#allocation5 + $0xc4] sm:$0xf0]  ;;  %v1048_v44 = vor.u32 %v1408_v36, %v1047_v35  ;;  %v1039_v47 = vld [vmem:[#allocation5 + $0x30] sm:$0xf] }
  0x20   :  { %545 = vmatpush.bf16.msra.mxu3 %v1256_v25  ;;  %v1175_v40 = vld [vmem:[#allocation5 + $0x140] sm:$0xf]  ;;  %v1440_v41 = vld [vmem:[#allocation5 + $0x144] sm:$0xf0]  ;;  %v1112_v45 = vor.u32 %v1424_v39, %v1111_v37  ;;  %v1406_v48 = vld [vmem:[#allocation5 + $0x34] sm:$0xf0] }
  0x21   :  { %v1239_v42 = vld [vmem:[#allocation5 + $0x1c0] sm:$0xf]  ;;  %v1456_v43 = vld [vmem:[#allocation5 + $0x1c4] sm:$0xf0]  ;;  %507 = vmatpush.bf16.msra.mxu0 %v1056_v29  ;;  %v1176_v46 = vor.u32 %v1440_v41, %v1175_v40  ;;  %v1103_v49 = vld [vmem:[#allocation5 + $0xb0] sm:$0xf]  ;;  %v1040_v56 = vor.u32 %v1406_v48, %v1039_v47 }
  0x22   :  { %520 = vmatpush.bf16.msra.mxu1 %v1120_v33  ;;  %v1240_v50 = vor.u32 %v1456_v43, %v1239_v42  ;;  %v1422_v51 = vld [vmem:[#allocation5 + $0xb4] sm:$0xf0]  ;;  %v1167_v52 = vld [vmem:[#allocation5 + $0x130] sm:$0xf]  ;;  %v1031_v59 = vld [vmem:[#allocation5 + $0x20] sm:$0xf] }
  0x23   :  { %533 = vmatpush.bf16.msra.mxu2 %v1184_v34  ;;  %v1438_v53 = vld [vmem:[#allocation5 + $0x134] sm:$0xf0]  ;;  %v1231_v54 = vld [vmem:[#allocation5 + $0x1b0] sm:$0xf]  ;;  %v1104_v57 = vor.u32 %v1422_v51, %v1103_v49  ;;  %v1404_v60 = vld [vmem:[#allocation5 + $0x24] sm:$0xf0] }
  0x24   :  { %546 = vmatpush.bf16.msra.mxu3 %v1248_v38  ;;  %v1454_v55 = vld [vmem:[#allocation5 + $0x1b4] sm:$0xf0]  ;;  %v1168_v58 = vor.u32 %v1438_v53, %v1167_v52  ;;  %v1095_v61 = vld [vmem:[#allocation5 + $0xa0] sm:$0xf]  ;;  %v1420_v63 = vld [vmem:[#allocation5 + $0xa4] sm:$0xf0]  ;;  %v1032_v4 = vor.u32 %v1404_v60, %v1031_v59 }
  0x25   :  { %508 = vmatpush.bf16.msra.mxu0 %v1048_v44  ;;  %v1232_v62 = vor.u32 %v1454_v55, %v1231_v54  ;;  %v1159_v0 = vld [vmem:[#allocation5 + $0x120] sm:$0xf]  ;;  %v1436_v1 = vld [vmem:[#allocation5 + $0x124] sm:$0xf0]  ;;  %v1096_v5 = vor.u32 %v1420_v63, %v1095_v61  ;;  %v1023_v7 = vld [vmem:[#allocation5 + $0x10] sm:$0xf] }
  0x26   :  { %521 = vmatpush.bf16.msra.mxu1 %v1112_v45  ;;  %v1223_v2 = vld [vmem:[#allocation5 + $0x1a0] sm:$0xf]  ;;  %v1452_v3 = vld [vmem:[#allocation5 + $0x1a4] sm:$0xf0]  ;;  %v1160_v6 = vor.u32 %v1436_v1, %v1159_v0  ;;  %v1402_v8 = vld [vmem:[#allocation5 + $0x14] sm:$0xf0] }
  0x27   :  { %534 = vmatpush.bf16.msra.mxu2 %v1176_v46  ;;  %v1087_v9 = vld [vmem:[#allocation5 + $0x90] sm:$0xf]  ;;  %v1224_v10 = vor.u32 %v1452_v3, %v1223_v2  ;;  %v1418_v11 = vld [vmem:[#allocation5 + $0x94] sm:$0xf0]  ;;  %v1015_v16 = vld [vmem:[#allocation5] sm:$0xf]  ;;  %v1024_v17 = vor.u32 %v1402_v8, %v1023_v7 }
  0x28   :  { %547 = vmatpush.bf16.msra.mxu3 %v1240_v50  ;;  %v1151_v12 = vld [vmem:[#allocation5 + $0x110] sm:$0xf]  ;;  %v1434_v13 = vld [vmem:[#allocation5 + $0x114] sm:$0xf0]  ;;  %v1400_v18 = vld [vmem:[#allocation5 + $0x4] sm:$0xf0]  ;;  %v1088_v21 = vor.u32 %v1418_v11, %v1087_v9 }
  0x29   :  { %509 = vmatpush.bf16.msra.mxu0 %v1040_v56  ;;  %v1215_v14 = vld [vmem:[#allocation5 + $0x190] sm:$0xf]  ;;  %v1450_v15 = vld [vmem:[#allocation5 + $0x194] sm:$0xf0]  ;;  %v1079_v19 = vld [vmem:[#allocation5 + $0x80] sm:$0xf]  ;;  %v1152_v22 = vor.u32 %v1434_v13, %v1151_v12  ;;  %v1016_v33 = vor.u32 %v1400_v18, %v1015_v16 }
  0x2a   :  { %522 = vmatpush.bf16.msra.mxu1 %v1104_v57  ;;  %v1416_v20 = vld [vmem:[#allocation5 + $0x84] sm:$0xf0]  ;;  %v1143_v23 = vld [vmem:[#allocation5 + $0x100] sm:$0xf]  ;;  %v100_v25 = vld [vmem:[#allocation2 + $0x8] sm:$0xff]  ;;  %v1216_v26 = vor.u32 %v1450_v15, %v1215_v14  ;;  %s1668_s26 = smov [#allocation11]  }
  0x2b   :  { %535 = vmatpush.bf16.msra.mxu2 %v1168_v58  ;;  %v1432_v24 = vld [vmem:[#allocation5 + $0x104] sm:$0xf0]  ;;  %v1207_v27 = vld [vmem:[#allocation5 + $0x180] sm:$0xf]  ;;  %v99_v29 = vld [vmem:[#allocation2] sm:$0xff]  ;;  %v175_v37 = vunpack.c.l.b16 %v100_v25  ;;  %v1080_v38 = vor.u32 %v1416_v20, %v1079_v19  ;;  %v176_v43 = vunpack.c.h.b16 %v100_v25  ;;  %s999_s27 = sshll.u32 %s1668_s26, 4  ;;  %s1000_s27 = int_to_ptr.vmem [resolvable:$true] %s999_s27 }
  0x2c   :  { %548 = vmatpush.bf16.msra.mxu3 %v1232_v62  ;;  %v1448_v28 = vld [vmem:[#allocation5 + $0x184] sm:$0xf0]  ;;  %v1413_v30 = vld [vmem:[#allocation5 + $0x74] sm:$0xf]  ;;  %v1073_v31 = vld [vmem:[#allocation5 + $0x78] sm:$0xf0]  ;;  %v1144_v39 = vor.u32 %v1432_v24, %v1143_v23  ;;  %v173_v42 = vunpack.c.l.b16 %v99_v29  ;;  %v174_v46 = vunpack.c.h.b16 %v99_v29 }
  0x2d   :  { %510 = vmatpush.bf16.msra.mxu0 %v1032_v4  ;;  %v1429_v32 = vld [vmem:[#allocation5 + $0xf4] sm:$0xf]  ;;  %v1137_v34 = vld [vmem:[#allocation5 + $0xf8] sm:$0xf0]  ;;  %v1208_v44 = vor.u32 %v1448_v28, %v1207_v27  ;;  %v1076_v45 = vor.u32 %v1413_v30, %v1073_v31  ;;  %v1411_v49 = vld [vmem:[#allocation5 + $0x64] sm:$0xf]  ;;  %v1724_v53 = vpack.c.b16 %v175_v37, %v175_v37  ;;  %v1728_v58 = vpack.c.b16 %v176_v43, %v176_v43 }
  0x2e   :  { %523 = vmatpush.bf16.msra.mxu1 %v1096_v5  ;;  %v1445_v35 = vld [vmem:[#allocation5 + $0x174] sm:$0xf]  ;;  %v1201_v36 = vld [vmem:[#allocation5 + $0x178] sm:$0xf0]  ;;  %v1140_v47 = vor.u32 %v1429_v32, %v1137_v34  ;;  %v1065_v50 = vld [vmem:[#allocation5 + $0x68] sm:$0xf0]  ;;  %v1726_v57 = vpack.c.b16 %v173_v42, %v173_v42  ;;  %v1730_v62 = vpack.c.b16 %v174_v46, %v174_v46 }
  0x2f   :  { %536 = vmatpush.bf16.msra.mxu2 %v1160_v6  ;;  %v1461_v40 = vld [vmem:[#allocation5 + $0x1f4] sm:$0xf]  ;;  %v1265_v41 = vld [vmem:[#allocation5 + $0x1f8] sm:$0xf0]  ;;  %v1204_v48 = vor.u32 %v1445_v35, %v1201_v36  ;;  %v1427_v51 = vld [vmem:[#allocation5 + $0xe4] sm:$0xf]  ;;  %v1068_v61 = vor.u32 %v1411_v49, %v1065_v50 }
  0x30   :  { %549 = vmatpush.bf16.msra.mxu3 %v1224_v10  ;;  %v1268_v52 = vor.u32 %v1461_v40, %v1265_v41  ;;  %v1129_v54 = vld [vmem:[#allocation5 + $0xe8] sm:$0xf0]  ;;  %v1443_v55 = vld [vmem:[#allocation5 + $0x164] sm:$0xf]  ;;  %v1409_v1 = vld [vmem:[#allocation5 + $0x54] sm:$0xf] }
  0x31   :  { %511 = vmatpush.bf16.msra.mxu0 %v1024_v17  ;;  %v1193_v56 = vld [vmem:[#allocation5 + $0x168] sm:$0xf0]  ;;  %v1459_v59 = vld [vmem:[#allocation5 + $0x1e4] sm:$0xf]  ;;  %v1132_v63 = vor.u32 %v1427_v51, %v1129_v54  ;;  %v1057_v2 = vld [vmem:[#allocation5 + $0x58] sm:$0xf0] }
  0x32   :  { %524 = vmatpush.bf16.msra.mxu1 %v1088_v21  ;;  %v1257_v60 = vld [vmem:[#allocation5 + $0x1e8] sm:$0xf0]  ;;  %v1196_v0 = vor.u32 %v1443_v55, %v1193_v56  ;;  %v1425_v3 = vld [vmem:[#allocation5 + $0xd4] sm:$0xf]  ;;  %v1121_v5 = vld [vmem:[#allocation5 + $0xd8] sm:$0xf0]  ;;  %v1060_v10 = vor.u32 %v1409_v1, %v1057_v2 }
  0x33   :  { %537 = vmatpush.bf16.msra.mxu2 %v1152_v22  ;;  %v1260_v4 = vor.u32 %v1459_v59, %v1257_v60  ;;  %v1441_v6 = vld [vmem:[#allocation5 + $0x154] sm:$0xf]  ;;  %v1185_v7 = vld [vmem:[#allocation5 + $0x158] sm:$0xf0]  ;;  %v1124_v11 = vor.u32 %v1425_v3, %v1121_v5  ;;  %v1407_v13 = vld [vmem:[#allocation5 + $0x44] sm:$0xf] }
  0x34   :  { %550 = vmatpush.bf16.msra.mxu3 %v1216_v26  ;;  %v1457_v8 = vld [vmem:[#allocation5 + $0x1d4] sm:$0xf]  ;;  %v1249_v9 = vld [vmem:[#allocation5 + $0x1d8] sm:$0xf0]  ;;  %v1188_v12 = vor.u32 %v1441_v6, %v1185_v7  ;;  %v1049_v14 = vld [vmem:[#allocation5 + $0x48] sm:$0xf0] }
  0x35   :  { %512 = vmatpush.bf16.msra.mxu0 %v1016_v33  ;;  %v1423_v15 = vld [vmem:[#allocation5 + $0xc4] sm:$0xf]  ;;  %v1252_v16 = vor.u32 %v1457_v8, %v1249_v9  ;;  %v1113_v17 = vld [vmem:[#allocation5 + $0xc8] sm:$0xf0]  ;;  %v1052_v22 = vor.u32 %v1407_v13, %v1049_v14  ;;  %v1405_v25 = vld [vmem:[#allocation5 + $0x34] sm:$0xf] }
  0x36   :  { %525 = vmatpush.bf16.msra.mxu1 %v1080_v38  ;;  %v1439_v18 = vld [vmem:[#allocation5 + $0x144] sm:$0xf]  ;;  %v1177_v19 = vld [vmem:[#allocation5 + $0x148] sm:$0xf0]  ;;  %v1116_v23 = vor.u32 %v1423_v15, %v1113_v17  ;;  %v1041_v26 = vld [vmem:[#allocation5 + $0x38] sm:$0xf0] }
  0x37   :  { %538 = vmatpush.bf16.msra.mxu2 %v1144_v39  ;;  %v1455_v20 = vld [vmem:[#allocation5 + $0x1c4] sm:$0xf]  ;;  %v1241_v21 = vld [vmem:[#allocation5 + $0x1c8] sm:$0xf0]  ;;  %v1180_v24 = vor.u32 %v1439_v18, %v1177_v19  ;;  %v1421_v27 = vld [vmem:[#allocation5 + $0xb4] sm:$0xf]  ;;  %v1044_v34 = vor.u32 %v1405_v25, %v1041_v26 }
  0x38   :  { %551 = vmatpush.bf16.msra.mxu3 %v1208_v44  ;;  %513 = vmatmul.bf16.vlgmr.msra.gmra.mxu0 %v1726_v57  ;;  %v1244_v28 = vor.u32 %v1455_v20, %v1241_v21  ;;  %v1105_v29 = vld [vmem:[#allocation5 + $0xb8] sm:$0xf0]  ;;  %v1437_v30 = vld [vmem:[#allocation5 + $0x134] sm:$0xf]  ;;  %v1403_v37 = vld [vmem:[#allocation5 + $0x24] sm:$0xf] }
  0x39   :  { %557 = vmatpush.bf16.msrb.mxu0 %v1076_v45  ;;  %526 = vmatmul.bf16.vlgmr.msra.gmra.mxu1 %v1730_v62  ;;  %v1169_v31 = vld [vmem:[#allocation5 + $0x138] sm:$0xf0]  ;;  %v1453_v32 = vld [vmem:[#allocation5 + $0x1b4] sm:$0xf]  ;;  %v1108_v35 = vor.u32 %v1421_v27, %v1105_v29  ;;  %v1033_v38 = vld [vmem:[#allocation5 + $0x28] sm:$0xf0] }
  0x3a   :  { %570 = vmatpush.bf16.msrb.mxu1 %v1140_v47  ;;  %539 = vmatmul.bf16.vlgmr.msra.gmra.mxu2 %v1724_v53  ;;  %v1233_v33 = vld [vmem:[#allocation5 + $0x1b8] sm:$0xf0]  ;;  %v1172_v36 = vor.u32 %v1437_v30, %v1169_v31  ;;  %v1419_v39 = vld [vmem:[#allocation5 + $0xa4] sm:$0xf]  ;;  %v1097_v41 = vld [vmem:[#allocation5 + $0xa8] sm:$0xf0]  ;;  %v1036_v46 = vor.u32 %v1403_v37, %v1033_v38 }
  0x3b   :  { %583 = vmatpush.bf16.msrb.mxu2 %v1204_v48  ;;  %552 = vmatmul.bf16.vlgmr.msra.gmra.mxu3 %v1728_v58  ;;  %v1236_v40 = vor.u32 %v1453_v32, %v1233_v33  ;;  %v1435_v42 = vld [vmem:[#allocation5 + $0x124] sm:$0xf]  ;;  %v1161_v43 = vld [vmem:[#allocation5 + $0x128] sm:$0xf0]  ;;  %v1100_v47 = vor.u32 %v1419_v39, %v1097_v41  ;;  %v1401_v49 = vld [vmem:[#allocation5 + $0x14] sm:$0xf] }
  0x3c   :  { %596 = vmatpush.bf16.msrb.mxu3 %v1268_v52  ;;  %v1451_v44 = vld [vmem:[#allocation5 + $0x1a4] sm:$0xf]  ;;  %v1225_v45 = vld [vmem:[#allocation5 + $0x1a8] sm:$0xf0]  ;;  %v1164_v48 = vor.u32 %v1435_v42, %v1161_v43  ;;  %v1025_v50 = vld [vmem:[#allocation5 + $0x18] sm:$0xf0] }
  0x3d   :  { %558 = vmatpush.bf16.msrb.mxu0 %v1068_v61  ;;  %v1417_v51 = vld [vmem:[#allocation5 + $0x94] sm:$0xf]  ;;  %v1228_v52 = vor.u32 %v1451_v44, %v1225_v45  ;;  %v1089_v54 = vld [vmem:[#allocation5 + $0x98] sm:$0xf0]  ;;  %v1028_v61 = vor.u32 %v1401_v49, %v1025_v50  ;;  %v1399_v1 = vld [vmem:[#allocation5 + $0x4] sm:$0xf] }
  0x3e   :  { %571 = vmatpush.bf16.msrb.mxu1 %v1132_v63  ;;  %v1433_v55 = vld [vmem:[#allocation5 + $0x114] sm:$0xf]  ;;  %v1153_v56 = vld [vmem:[#allocation5 + $0x118] sm:$0xf0]  ;;  %v1092_v63 = vor.u32 %v1417_v51, %v1089_v54  ;;  %v1017_v2 = vld [vmem:[#allocation5 + $0x8] sm:$0xf0] }
  0x3f   :  { %584 = vmatpush.bf16.msrb.mxu2 %v1196_v0  ;;  %v1449_v59 = vld [vmem:[#allocation5 + $0x194] sm:$0xf]  ;;  %v1217_v60 = vld [vmem:[#allocation5 + $0x198] sm:$0xf0]  ;;  %v1156_v0 = vor.u32 %v1433_v55, %v1153_v56  ;;  %v1415_v3 = vld [vmem:[#allocation5 + $0x84] sm:$0xf] }
  0x40   :  { %597 = vmatpush.bf16.msrb.mxu3 %v1260_v4  ;;  %v1220_v4 = vor.u32 %v1449_v59, %v1217_v60  ;;  %v1081_v5 = vld [vmem:[#allocation5 + $0x88] sm:$0xf0]  ;;  %v1431_v6 = vld [vmem:[#allocation5 + $0x104] sm:$0xf]  ;;  %v1740_v14 = vld [vmem:[#allocation7] sm:$0x3] }
  0x41   :  { %559 = vmatpush.bf16.msrb.mxu0 %v1060_v10  ;;  %v1145_v7 = vld [vmem:[#allocation5 + $0x108] sm:$0xf0]  ;;  %v1447_v8 = vld [vmem:[#allocation5 + $0x184] sm:$0xf]  ;;  %v1020_v10 = vor.u32 %v1399_v1, %v1017_v2  ;;  %v167_v15 = vperm.slane %v1740_v14, 0  ;;  %s1001_s30 = sshll.u32 %s1810_s7, 4  ;;  %s1002_s30 = int_to_ptr.hbm [resolvable:$true] %s1001_s30 }
  0x42   :  { %572 = vmatpush.bf16.msrb.mxu1 %v1124_v11  ;;  %v1209_v9 = vld [vmem:[#allocation5 + $0x188] sm:$0xf0]  ;;  %v1084_v11 = vor.u32 %v1415_v3, %v1081_v5  ;;  %v1478_v17 = vld [vmem:[#allocation8 + $0x74] sm:$0xf0]  ;;  %v1477_v20 = vld [vmem:[#allocation8 + $0x74] sm:$0xf] }
  0x43   :  { %585 = vmatpush.bf16.msrb.mxu2 %v1188_v12  ;;  %v1148_v12 = vor.u32 %v1431_v6, %v1145_v7  ;;  %v1212_v13 = vor.u32 %v1447_v8, %v1209_v9  ;;  %v1331_v21 = vld [vmem:[#allocation8 + $0x78] sm:$0xf0]  ;;  %v1475_v25 = vld [vmem:[#allocation8 + $0x64] sm:$0xf]  ;;  %v1323_v27 = vld [vmem:[#allocation8 + $0x68] sm:$0xf0] }
  0x44   :  { %598 = vmatpush.bf16.msrb.mxu3 %v1252_v16  ;;  %v1329_v16 = vld [vmem:[#allocation8 + $0x70] sm:$0xf]  ;;  %v1326_v30 = vor.u32 %v1475_v25, %v1323_v27  ;;  %v1315_v38 = vld [vmem:[#allocation8 + $0x58] sm:$0xf0]  ;;  %v1305_v42 = vld [vmem:[#allocation8 + $0x40] sm:$0xf] }
  0x45   :  { %560 = vmatpush.bf16.msrb.mxu0 %v1052_v22  ;;  %v1330_v19 = vor.u32 %v1478_v17, %v1329_v16  ;;  %v1313_v33 = vld [vmem:[#allocation8 + $0x50] sm:$0xf]  ;;  %v1472_v43 = vld [vmem:[#allocation8 + $0x44] sm:$0xf0]  ;;  %v1471_v44 = vld [vmem:[#allocation8 + $0x44] sm:$0xf] }
  0x46   :  { %573 = vmatpush.bf16.msrb.mxu1 %v1116_v23  ;;  %v1297_v54 = vld [vmem:[#allocation8 + $0x30] sm:$0xf]  ;;  %v1470_v55 = vld [vmem:[#allocation8 + $0x34] sm:$0xf0]  ;;  %v1469_v56 = vld [vmem:[#allocation8 + $0x34] sm:$0xf] }
  0x47   :  { %586 = vmatpush.bf16.msrb.mxu2 %v1180_v24  ;;  %v1334_v24 = vor.u32 %v1477_v20, %v1331_v21  ;;  %v1299_v59 = vld [vmem:[#allocation8 + $0x38] sm:$0xf0]  ;;  %v1289_v3 = vld [vmem:[#allocation8 + $0x20] sm:$0xf]  ;;  %v1467_v5 = vld [vmem:[#allocation8 + $0x24] sm:$0xf] }
  0x48   :  { %599 = vmatpush.bf16.msrb.mxu3 %v1244_v28  ;;  %v1291_v7 = vld [vmem:[#allocation8 + $0x28] sm:$0xf0]  ;;  %v168_v16 = vperm.slane %v1740_v14, 1  ;;  %v1393_v27 = vld [vmem:[#allocation8 + $0xf0] sm:$0xf] }
  0x49   :  { %561 = vmatpush.bf16.msrb.mxu0 %v1044_v34  ;;  %v1474_v34 = vld [vmem:[#allocation8 + $0x54] sm:$0xf0] }
  0x4a   :  { %574 = vmatpush.bf16.msrb.mxu1 %v1108_v35  ;;  %v1473_v35 = vld [vmem:[#allocation8 + $0x54] sm:$0xf]  ;;  %v1314_v37 = vor.u32 %v1474_v34, %v1313_v33  ;;  %v1494_v14 = vld [vmem:[#allocation8 + $0xf4] sm:$0xf0]  ;;  %v1395_v34 = vld [vmem:[#allocation8 + $0xf8] sm:$0xf0] }
  0x4b   :  { %587 = vmatpush.bf16.msrb.mxu2 %v1172_v36  ;;  %v1493_v33 = vld [vmem:[#allocation8 + $0xf4] sm:$0xf] }
  0x4c   :  { %600 = vmatpush.bf16.msrb.mxu3 %v1236_v40  ;;  %v1318_v40 = vor.u32 %v1473_v35, %v1315_v38  ;;  %v1385_v38 = vld [vmem:[#allocation8 + $0xe0] sm:$0xf] }
  0x4d   :  { %562 = vmatpush.bf16.msrb.mxu0 %v1036_v46  ;;  %v1306_v46 = vor.u32 %v1472_v43, %v1305_v42 }
  0x4e   :  { %575 = vmatpush.bf16.msrb.mxu1 %v1100_v47  ;;  %v1307_v47 = vld [vmem:[#allocation8 + $0x48] sm:$0xf0] }
  0x4f   :  { %588 = vmatpush.bf16.msrb.mxu2 %v1164_v48  ;;  %v1310_v50 = vor.u32 %v1471_v44, %v1307_v47 }
  0x50   :  { %601 = vmatpush.bf16.msrb.mxu3 %v1228_v52 }
  0x51   :  { %563 = vmatpush.bf16.msrb.mxu0 %v1028_v61 }
  0x52   :  { %576 = vmatpush.bf16.msrb.mxu1 %v1092_v63  ;;  %v1298_v63 = vor.u32 %v1470_v55, %v1297_v54  ;;  %v1377_v54 = vld [vmem:[#allocation8 + $0xd0] sm:$0xf]  ;;  %v1490_v55 = vld [vmem:[#allocation8 + $0xd4] sm:$0xf0] }
  0x53   :  { %589 = vmatpush.bf16.msrb.mxu2 %v1156_v0  ;;  %v1302_v0 = vor.u32 %v1469_v56, %v1299_v59  ;;  %v1378_v59 = vor.u32 %v1490_v55, %v1377_v54 }
  0x54   :  { %602 = vmatpush.bf16.msrb.mxu3 %v1220_v4  ;;  %v1468_v4 = vld [vmem:[#allocation8 + $0x24] sm:$0xf0] }
  0x55   :  { %564 = vmatpush.bf16.msrb.mxu0 %v1020_v10  ;;  %v1290_v6 = vor.u32 %v1468_v4, %v1289_v3  ;;  %v1294_v10 = vor.u32 %v1467_v5, %v1291_v7  ;;  %v1488_v5 = vld [vmem:[#allocation8 + $0xc4] sm:$0xf0]  ;;  %v1371_v7 = vld [vmem:[#allocation8 + $0xc8] sm:$0xf0] }
  0x56   :  { %577 = vmatpush.bf16.msrb.mxu1 %v1084_v11 }
  0x57   :  { %590 = vmatpush.bf16.msrb.mxu2 %v1148_v12  ;;  %v1281_v12 = vld [vmem:[#allocation8 + $0x10] sm:$0xf] }
  0x58   :  { %603 = vmatpush.bf16.msrb.mxu3 %v1212_v13  ;;  %565 = vmatmul.bf16.vlgmr.msrb.gmra.mxu0 %v1726_v57  ;;  %v1466_v13 = vld [vmem:[#allocation8 + $0x14] sm:$0xf0] }
  0x59   :  { %578 = vmatmul.bf16.vlgmr.msrb.gmra.mxu1 %v1730_v62  ;;  %897 = vmatpush.bf16.msra.mxu0 %v1330_v19  ;;  %v1321_v62 = vld [vmem:[#allocation8 + $0x60] sm:$0xf]  ;;  %v1282_v17 = vor.u32 %v1466_v13, %v1281_v12 }
  0x5a   :  { %591 = vmatmul.bf16.vlgmr.msrb.gmra.mxu2 %v1724_v53  ;;  %v1476_v53 = vld [vmem:[#allocation8 + $0x64] sm:$0xf0] }
  0x5b   :  { %604 = vmatmul.bf16.vlgmr.msrb.gmra.mxu3 %v1728_v58  ;;  %923 = vmatpush.bf16.msra.mxu2 %v1334_v24  ;;  %v1322_v26 = vor.u32 %v1476_v53, %v1321_v62  ;;  %v1273_v24 = vld [vmem:[#allocation8] sm:$0xf]  ;;  %v1463_v62 = vld [vmem:[#allocation8 + $0x4] sm:$0xf] }
  0x5d   :  { %898 = vmatpush.bf16.msra.mxu0 %v1322_v26  ;;  %v1275_v26 = vld [vmem:[#allocation8 + $0x8] sm:$0xf0] }
  0x5f   :  { %924 = vmatpush.bf16.msra.mxu2 %v1326_v30  ;;  %v1278_v30 = vor.u32 %v1463_v62, %v1275_v26 }
  0x61   :  { %899 = vmatpush.bf16.msra.mxu0 %v1314_v37 }
  0x63   :  { %925 = vmatpush.bf16.msra.mxu2 %v1318_v40  ;;  %v1492_v40 = vld [vmem:[#allocation8 + $0xe4] sm:$0xf0] }
  0x64   :  { %v1386_v44 = vor.u32 %v1492_v40, %v1385_v38 }
  0x65   :  { %900 = vmatpush.bf16.msra.mxu0 %v1306_v46 }
  0x67   :  { %926 = vmatpush.bf16.msra.mxu2 %v1310_v50 }
  0x69   :  { %901 = vmatpush.bf16.msra.mxu0 %v1298_v63 }
  0x6b   :  { %927 = vmatpush.bf16.msra.mxu2 %v1302_v0 }
  0x6d   :  { %902 = vmatpush.bf16.msra.mxu0 %v1290_v6  ;;  %v1487_v6 = vld [vmem:[#allocation8 + $0xc4] sm:$0xf] }
  0x6f   :  { %928 = vmatpush.bf16.msra.mxu2 %v1294_v10 }
  0x71   :  { %903 = vmatpush.bf16.msra.mxu0 %v1282_v17 }
  0xb5   :  { %v514_v18 = vpop.f32.mrf.mxu0 }
  0xb6   :  { %v515_v22 = vadd.f32 %v514_v18, %v167_v15  ;;  %v527_v23 = vpop.f32.mrf.mxu1  ;;  %v1465_v15 = vld [vmem:[#allocation8 + $0x14] sm:$0xf]  ;;  %v1283_v18 = vld [vmem:[#allocation8 + $0x18] sm:$0xf0] }
  0xb7   :  { %v1286_v21 = vor.u32 %v1465_v15, %v1283_v18 }
  0xb8   :  { %v528_v57 = vadd.f32 %v527_v23, %v515_v22 }
  0xb9   :  { %929 = vmatpush.bf16.msra.mxu2 %v1286_v21 }
  0xbd   :  { %v540_v58 = vpop.f32.mrf.mxu2  ;;  %v516_v32 = vpop.f32.mrf.mxu0  ;;  %930 = vmatpush.bf16.msra.mxu2 %v1278_v30  ;;  %v1484_v30 = vld [vmem:[#allocation8 + $0xa4] sm:$0xf0] }
  0xbe   :  { %v541_v28 = vadd.f32 %v540_v58, %v528_v57  ;;  %v553_v29 = vpop.f32.mrf.mxu3  ;;  %v529_v36 = vpop.f32.mrf.mxu1  ;;  %v1464_v57 = vld [vmem:[#allocation8 + $0x4] sm:$0xf0]  ;;  %v1394_v32 = vor.u32 %v1494_v14, %v1393_v27 }
  0xbf   :  { %v1274_v58 = vor.u32 %v1464_v57, %v1273_v24  ;;  %v1398_v36 = vor.u32 %v1493_v33, %v1395_v34  ;;  %v1355_v33 = vld [vmem:[#allocation8 + $0xa8] sm:$0xf0] }
  0xc0   :  { %v1743_v31 = vadd.f32 %v553_v29, %v541_v28  ;;  %910 = vmatpush.bf16.msra.mxu1 %v1394_v32  ;;  %v1483_v32 = vld [vmem:[#allocation8 + $0xa4] sm:$0xf] }
  0xc1   :  { %904 = vmatpush.bf16.msra.mxu0 %v1274_v58  ;;  %936 = vmatpush.bf16.msra.mxu3 %v1398_v36  ;;  %v1358_v40 = vor.u32 %v1483_v32, %v1355_v33 }
  0xc2   :  { %v1746_v39 = vmul.f32 0.70710677, %v1743_v31 }
  0xc4   :  { %v613_v41 = vmul.f32 %v1746_v39, %v1746_v39  ;;  %911 = vmatpush.bf16.msra.mxu1 %v1386_v44  ;;  %v1345_v44 = vld [vmem:[#allocation8 + $0x90] sm:$0xf] }
  0xc5   :  { %v542_v45 = vpop.f32.mrf.mxu2 }
  0xc6   :  { %v1750_v48 = vmin.f32 %v613_v41, 16.0  ;;  %v555_v49 = vpop.f32.mrf.mxu3  ;;  %v1491_v41 = vld [vmem:[#allocation8 + $0xe4] sm:$0xf]  ;;  %v1387_v45 = vld [vmem:[#allocation8 + $0xe8] sm:$0xf0] }
  0xc7   :  { %v1390_v47 = vor.u32 %v1491_v41, %v1387_v45  ;;  %v1481_v45 = vld [vmem:[#allocation8 + $0x94] sm:$0xf] }
  0xc8   :  { %v615_v51 = vmul.f32 2.1237322e-06, %v1750_v48  ;;  %v626_v52 = vmul.f32 3.8918573e-05, %v1750_v48  ;;  %912 = vmatpush.bf16.msra.mxu1 %v1378_v59  ;;  %v1337_v59 = vld [vmem:[#allocation8 + $0x80] sm:$0xf] }
  0xc9   :  { %937 = vmatpush.bf16.msra.mxu3 %v1390_v47 }
  0xca   :  { %v616_v60 = vadd.f32 0.00028619796, %v615_v51  ;;  %v627_v61 = vadd.f32 0.001143296, %v626_v52 }
  0xcc   :  { %v617_v1 = vmul.f32 %v616_v60, %v1750_v48  ;;  %v628_v2 = vmul.f32 %v627_v61, %v1750_v48  ;;  %v1489_v60 = vld [vmem:[#allocation8 + $0xd4] sm:$0xf]  ;;  %v1379_v61 = vld [vmem:[#allocation8 + $0xd8] sm:$0xf0] }
  0xcd   :  { %v1382_v0 = vor.u32 %v1489_v60, %v1379_v61  ;;  %v1480_v60 = vld [vmem:[#allocation8 + $0x84] sm:$0xf0]  ;;  %v1479_v61 = vld [vmem:[#allocation8 + $0x84] sm:$0xf] }
  0xce   :  { %v618_v8 = vadd.f32 0.0036580483, %v617_v1  ;;  %v629_v9 = vadd.f32 0.014752088, %v628_v2  ;;  %v1369_v2 = vld [vmem:[#allocation8 + $0xc0] sm:$0xf] }
  0xcf   :  { %938 = vmatpush.bf16.msra.mxu3 %v1382_v0 }
  0xd0   :  { %v630_v11 = vmul.f32 %v629_v9, %v1750_v48  ;;  %v619_v19 = vmul.f32 %v618_v8, %v1750_v48 }
  0xd2   :  { %v631_v20 = vadd.f32 0.112945676, %v630_v11  ;;  %v620_v28 = vadd.f32 0.05243302, %v619_v19  ;;  %v1370_v11 = vor.u32 %v1488_v5, %v1369_v2  ;;  %v1361_v19 = vld [vmem:[#allocation8 + $0xb0] sm:$0xf] }
  0xd4   :  { %v632_v22 = vmul.f32 %v631_v20, %v1750_v48  ;;  %v621_v42 = vmul.f32 %v620_v28, %v1750_v48  ;;  %913 = vmatpush.bf16.msra.mxu1 %v1370_v11  ;;  %v1353_v28 = vld [vmem:[#allocation8 + $0xa0] sm:$0xf] }
  0xd5   :  { %v566_v23 = vpop.f32.mrf.mxu0 }
  0xd6   :  { %v567_v53 = vadd.f32 %v566_v23, %v168_v16  ;;  %v579_v25 = vpop.f32.mrf.mxu1  ;;  %v633_v29 = vadd.f32 0.4994258, %v632_v22  ;;  %v622_v56 = vadd.f32 0.18741608, %v621_v42  ;;  %v1374_v16 = vor.u32 %v1487_v6, %v1371_v7  ;;  %v1485_v22 = vld [vmem:[#allocation8 + $0xb4] sm:$0xf] }
  0xd7   :  { %v1363_v23 = vld [vmem:[#allocation8 + $0xb8] sm:$0xf0] }
  0xd8   :  { %v634_v35 = vmul.f32 %v633_v29, %v1750_v48  ;;  %v580_v37 = vadd.f32 %v579_v25, %v567_v53  ;;  %v623_v4 = vmul.f32 %v622_v56, %v1750_v48  ;;  %v1486_v48 = vld [vmem:[#allocation8 + $0xb4] sm:$0xf0]  ;;  %939 = vmatpush.bf16.msra.mxu3 %v1374_v16  ;;  %v1366_v53 = vor.u32 %v1485_v22, %v1363_v23 }
  0xd9   :  { %v1362_v21 = vor.u32 %v1486_v48, %v1361_v19 }
  0xda   :  { %v635_v43 = vadd.f32 1.0, %v634_v35  ;;  %v624_v20 = vadd.f32 1.1283791, %v623_v4  ;;  %v1339_v4 = vld [vmem:[#allocation8 + $0x88] sm:$0xf0] }
  0xdb   :  { %914 = vmatpush.bf16.msra.mxu1 %v1362_v21  ;;  %v1342_v5 = vor.u32 %v1479_v61, %v1339_v4 }
  0xdc   :  { %1503 = vrcp.f32 %v635_v43  ;;  %v645_v12 = vand.u32 2147483647, %v635_v43  ;;  %v647_v13 = vand.u32 2147483648, %v635_v43  ;;  %vm641_vm1 = vweird.f32 %v635_v43  ;;  %940 = vmatpush.bf16.msra.mxu3 %v1366_v53 }
  0xdd   :  { %v592_v46 = vpop.f32.mrf.mxu2  ;;  %v568_v50 = vpop.f32.mrf.mxu0  ;;  %v625_v29 = vmul.f32 %v624_v20, %v1746_v39  ;;  %v1482_v39 = vld [vmem:[#allocation8 + $0x94] sm:$0xf0] }
  0xde   :  { %v605_v49 = vpop.f32.mrf.mxu3  ;;  %v593_v51 = vadd.f32 %v592_v46, %v580_v37  ;;  %v581_v52 = vpop.f32.mrf.mxu1  ;;  %vm1774_vm2 = vcmp.eq.f32.partialorder %v645_v12, 8.507059e+37  ;;  %v648_v58 = vor.u32 1.1754944e-38, %v647_v13  ;;  %v1354_v37 = vor.u32 %v1484_v30, %v1353_v28  ;;  %v1347_v46 = vld [vmem:[#allocation8 + $0x98] sm:$0xf0] }
  0xdf   :  { %v1346_v50 = vor.u32 %v1482_v39, %v1345_v44  ;;  %v609_v52 = vmul.f32 0.5, %v1743_v31 }
  0xe0   :  { %v1762_v63 = vadd.f32 %v605_v49, %v593_v51  ;;  %915 = vmatpush.bf16.msra.mxu1 %v1354_v37  ;;  %941 = vmatpush.bf16.msra.mxu3 %v1358_v40  ;;  %v1350_v51 = vor.u32 %v1481_v45, %v1347_v46 }
  0xe2   :  { %v1765_v1 = vmul.f32 0.70710677, %v1762_v63  ;;  %v1504_v3 = vpop.eup %1503 }
  0xe3   :  { %v637_v8 = vmul.f32 %v1504_v3, %v635_v43  ;;  %vm642_vm0 = vweird.f32 %v1504_v3 }
  0xe4   :  { %v653_v9 = vmul.f32 %v1765_v1, %v1765_v1  ;;  %vm643_vm3 = vmor %vm641_vm1, %vm642_vm0  ;;  %916 = vmatpush.bf16.msra.mxu1 %v1346_v50  ;;  %942 = vmatpush.bf16.msra.mxu3 %v1350_v51 }
  0xe5   :  { %v594_v10 = vpop.f32.mrf.mxu2  ;;  %v638_v17 = vsub.f32 1.0, %v637_v8 }
  0xe6   :  { %v607_v15 = vpop.f32.mrf.mxu3  ;;  %v1770_v18 = vmin.f32 %v653_v9, 16.0 }
  0xe7   :  { %v639_v24 = vmul.f32 %v1504_v3, %v638_v17 }
  0xe8   :  { %v655_v57 = vmul.f32 2.1237322e-06, %v1770_v18  ;;  %v666_v62 = vmul.f32 3.8918573e-05, %v1770_v18  ;;  %943 = vmatpush.bf16.msra.mxu3 %v1342_v5 }
  0xe9   :  { %v640_v26 = vadd.f32 %v1504_v3, %v639_v24 }
  0xea   :  { %v656_v27 = vadd.f32 0.00028619796, %v655_v57  ;;  %v667_v14 = vadd.f32 0.001143296, %v666_v62 }
  0xeb   :  { %v644_v34 = vsel %vm643_vm3, %v1504_v3, %v640_v26  ;;  %v1338_v3 = vor.u32 %v1480_v60, %v1337_v59 }
  0xec   :  { %v657_v35 = vmul.f32 %v656_v27, %v1770_v18  ;;  %v668_v36 = vmul.f32 %v667_v14, %v1770_v18  ;;  %v649_v38 = vsel %vm1774_vm2, %v648_v58, %v644_v34 }
  0xed   :  { %v650_v41 = vmul.f32 %v649_v38, %v625_v29  ;;  %917 = vmatpush.bf16.msra.mxu1 %v1338_v3  ;;  %v984_v3 = vld [vmem:[#allocation10] sm:$0x3] }
  0xee   :  { %v658_v42 = vadd.f32 0.0036580483, %v657_v35  ;;  %v669_v43 = vadd.f32 0.014752088, %v668_v36 }
  0xef   :  { %v1269_v47 = vclamps-f32 %v650_v41, 1.0 }
  0xf0   :  { %v670_v49 = vmul.f32 %v669_v43, %v1770_v18  ;;  %v659_v56 = vmul.f32 %v658_v42, %v1770_v18 }
  0xf1   :  { %v693_v54 = vadd.f32 1.0, %v1269_v47 }
  0xf2   :  { %v671_v55 = vadd.f32 0.112945676, %v670_v49  ;;  %v660_v8 = vadd.f32 0.05243302, %v659_v56 }
  0xf3   :  { %v695_v0 = vmul.f32 %v693_v54, %v609_v52 }
  0xf4   :  { %v672_v2 = vmul.f32 %v671_v55, %v1770_v18  ;;  %v661_v11 = vmul.f32 %v660_v8, %v1770_v18 }
  0xf5   :  { %v697_v7 = vpack.c.bf16 %v695_v0, %v695_v0  ;;  %v976_v0 = vld [vmem:[%s1808_s5] sm:$0x3] }
  0xf6   :  { %v673_v6 = vadd.f32 0.4994258, %v672_v2  ;;  %v662_v12 = vadd.f32 0.18741608, %v661_v11  ;;  %v978_v4 = vperm.slane %v976_v0, 0  ;;  %v979_v5 = vperm.slane %v976_v0, 1 }
  0xf7   :  { %905 = vmatmul.bf16.vlgmr.msra.gmra.mxu0 %v697_v7  ;;  %931 = vmatmul.bf16.vlgmr.msra.gmra.mxu2 %v697_v7 }
  0xf8   :  { %v674_v9 = vmul.f32 %v673_v6, %v1770_v18  ;;  %v663_v15 = vmul.f32 %v662_v12, %v1770_v18  ;;  %v610_v18 = vmul.f32 0.5, %v1762_v63 }
  0xfa   :  { %v675_v10 = vadd.f32 1.0, %v674_v9  ;;  %v664_v48 = vadd.f32 1.1283791, %v663_v15  ;;  %v986_v9 = vperm.slane %v984_v3, 0 }
  0xfc   :  { %1505 = vrcp.f32 %v675_v10  ;;  %v687_v19 = vand.u32 2147483648, %v675_v10  ;;  %v685_v21 = vand.u32 2147483647, %v675_v10  ;;  %vm681_vm5 = vweird.f32 %v675_v10 }
  0xfd   :  { %v665_v24 = vmul.f32 %v664_v48, %v1765_v1  ;;  %v731_v1 = vld [vmem:[%s1807_s4] sm:$0x3] }
  0xfe   :  { %v688_v23 = vor.u32 1.1754944e-38, %v687_v19  ;;  %vm686_vm7 = vcmp.eq.f32.partialorder %v685_v21, 8.507059e+37  ;;  %v733_v32 = vperm.slane %v731_v1, 0  ;;  %v734_v34 = vperm.slane %v731_v1, 1 }
 0x102   :  { %v1506_v13 = vpop.eup %1505 }
 0x103   :  { %v677_v16 = vmul.f32 %v1506_v13, %v675_v10  ;;  %vm682_vm4 = vweird.f32 %v1506_v13  ;;  %v987_v10 = vperm.slane %v984_v3, 1 }
 0x104   :  { %vm683_vm6 = vmor %vm681_vm5, %vm682_vm4 }
 0x105   :  { %v678_v17 = vsub.f32 1.0, %v677_v16 }
 0x107   :  { %v679_v20 = vmul.f32 %v1506_v13, %v678_v17 }
 0x109   :  { %v680_v22 = vadd.f32 %v1506_v13, %v679_v20 }
 0x10b   :  { %v684_v57 = vsel %vm683_vm6, %v1506_v13, %v680_v22 }
 0x10c   :  { %v689_v62 = vsel %vm686_vm7, %v688_v23, %v684_v57 }
 0x10d   :  { %v690_v53 = vmul.f32 %v689_v62, %v665_v24 }
 0x10f   :  { %v1270_v25 = vclamps-f32 %v690_v53, 1.0 }
 0x111   :  { %v694_v58 = vadd.f32 1.0, %v1270_v25 }
 0x113   :  { %v696_v26 = vmul.f32 %v694_v58, %v610_v18 }
 0x115   :  { %v698_v27 = vpack.c.bf16 %v696_v26, %v696_v26 }
 0x117   :  { %918 = vmatmul.bf16.vlgmr.msra.gmra.mxu1 %v698_v27  ;;  %944 = vmatmul.bf16.vlgmr.msra.gmra.mxu3 %v698_v27 }
 0x174   :  { %v906_v14 = vpop.f32.mrf.mxu0 }
 0x175   :  { %v907_v35 = vadd.f32 %v906_v14, %v733_v32 }
 0x17a   :  { %v932_v28 = vpop.f32.mrf.mxu2 }
 0x17b   :  { %v933_v36 = vadd.f32 %v932_v28, %v734_v34 }
 0x17c   :  { %v908_v29 = vpop.f32.mrf.mxu0 }
 0x182   :  { %v934_v30 = vpop.f32.mrf.mxu2 }
 0x194   :  { %v919_v33 = vpop.f32.mrf.mxu1 }
 0x195   :  { %v920_v37 = vadd.f32 %v919_v33, %v907_v35 }
 0x197   :  { %v949_v42 = vadd.f32 %v920_v37, %v1743_v31 }
 0x19a   :  { %v945_v38 = vpop.f32.mrf.mxu3 }
 0x19b   :  { %v946_v40 = vadd.f32 %v945_v38, %v933_v36 }
 0x19c   :  { %v921_v41 = vpop.f32.mrf.mxu1 }
 0x19d   :  { %v950_v43 = vadd.f32 %v946_v40, %v1762_v63 }
 0x19f   :  { %v951_v44 = vadd.f32 %v950_v43, %v949_v42 }
 0x1a1   :  { %952 = vadd.xlane.f32.xlu0 %v951_v44 }
 0x1a2   :  { %v947_v39 = vpop.f32.mrf.mxu3 }
 0x214   :  { %v953_v45 = vpop.xlane.xlu0 %952 }
 0x215   :  { %v954_v46 = vmul.f32 0.00390625, %v953_v45 }
 0x217   :  { %v955_v47 = vsub.f32 %v949_v42, %v954_v46  ;;  %v956_v49 = vsub.f32 %v950_v43, %v954_v46 }
 0x219   :  { %v957_v50 = vmul.f32 %v955_v47, %v955_v47  ;;  %v958_v51 = vmul.f32 %v956_v49, %v956_v49 }
 0x21b   :  { %v959_v52 = vadd.f32 %v958_v51, %v957_v50 }
 0x21d   :  { %960 = vadd.xlane.f32.xlu0 %v959_v52 }
 0x290   :  { %v961_v54 = vpop.xlane.xlu0 %960 }
 0x291   :  { %v962_v55 = vmul.f32 0.00390625, %v961_v54 }
 0x293   :  { %v963_v56 = vadd.f32 1e-05, %v962_v55 }
 0x295   :  { %1507 = vrsqrt.f32 %v963_v56  ;;  %vm970_vm9 = vweird.f32 %v963_v56 }
 0x29b   :  { %v1508_v59 = vpop.eup %1507 }
 0x29c   :  { %v965_v60 = vmul.f32 %v1508_v59, %v963_v56  ;;  %vm971_vm8 = vweird.f32 %v1508_v59 }
 0x29d   :  { %vm972_vm10 = vmor %vm970_vm9, %vm971_vm8 }
 0x29e   :  { %v966_v31 = vmul.f32 %v1508_v59, %v965_v60 }
 0x2a0   :  { %v967_v61 = vmul.f32 0.5, %v966_v31 }
 0x2a2   :  { %v968_v63 = vsub.f32 1.5, %v967_v61 }
 0x2a4   :  { %v969_v2 = vmul.f32 %v1508_v59, %v968_v63 }
 0x2a6   :  { %v973_v6 = vsel %vm972_vm10, %v1508_v59, %v969_v2 }
 0x2a7   :  { %v974_v7 = vmul.f32 %v973_v6, %v955_v47  ;;  %v975_v8 = vmul.f32 %v973_v6, %v956_v49 }
 0x2a9   :  { %v982_v11 = vmul.f32 %v978_v4, %v974_v7  ;;  %v983_v12 = vmul.f32 %v979_v5, %v975_v8 }
 0x2ab   :  { %v990_v13 = vadd.f32 %v986_v9, %v982_v11  ;;  %v991_v15 = vadd.f32 %v987_v10, %v983_v12 }
 0x2ad   :  { %992 = vst [vmem:[#allocation11] sm:$0xff] %v990_v13 }
 0x2ae   :  { %993 = vst [vmem:[#allocation11 + $0x8] sm:$0xff] %v991_v15 }
 0x2af   :  { %1004 = dma.vmem_to_hbm [thread:$0]  %s1000_s27, 256, %s1002_s30, [#allocation4]  }
 0x2b0   :  { %1659 = dma.done.wait [#allocation4], 256  }
 0x2b1   :  { %1660 = vsyncadd [#allocation4], 4294967040 }
 0x2b2   :  { %1009 = vsyncpa [#allocation3], 1 }
 0x2b3   :  { %1010 = vsyncpa [#allocation6], 1 }
 0x2b4   :  { %1011 = vsyncpa [#allocation9], 1 }
 0x2b5   :  { %1012 = vsyncpa [#allocation4], 1 }

</bundles_post_ra>
